<compile_context>
chip_gen: v7x
topology: tpu7x:2x2x1
jax: 0.10.0
libtpu: 0.0.40
codegen_flags: <defaults>
</compile_context>

<pallas_src>
import functools

import jax
import jax.numpy as jnp
from jax import lax
from jax.experimental import pallas as pl
from jax.experimental.pallas import tpu as pltpu


# ---------------------------------------------------------------------------
# Geometry fixed by the PyTorch module (Linear(256, 32) => 16 ch * 4 * 4):
#   1x60x60 -> conv,conv -> 56 -> pool 28 -> conv,conv -> 24 -> pool 12
#           -> conv,conv -> 8  -> pool 4  -> flatten 256 -> fc 32 -> fc out
# In-kernel layout: per image, lane p = i*WS + j (row-major, row stride WS=64);
# after each pool the data keeps its flat position and its logical stride
# doubles ("dilated" storage), so every spatial shift is a plain pltpu.roll.
# ---------------------------------------------------------------------------
H_IN, W_IN = 60, 60
WS = 64                       # padded row stride
L0 = H_IN * WS                # 3840 = 30*128 lanes per image (fixed all layers)
BN_EPS = 1e-5
FC_H = 4                      # post-pool3 map is 4x4 at stride 8


def _round_up(n, m):
    return -(-n // m) * m


def _check_geometry():
    """Static proof that every lane read stays inside one image's L0 window,
    so the circular pltpu.roll wrap can only land in lanes never read as valid."""
    assert W_IN <= WS and L0 == H_IN * WS and L0 % 128 == 0
    h, stride = H_IN, 1
    for _blk in range(3):
        for _conv in range(2):
            # last valid conv output reads tap (2,2) at input coord (h-1, h-1)
            assert (h - 1) * stride * (WS + 1) < L0
            h -= 2
        assert (h - 1) * stride * (WS + 1) < L0      # pool reads (h-1, h-1)
        assert h % 2 == 0
        h //= 2
        stride *= 2
    assert (h, stride) == (FC_H, 8)
    assert (stride * WS) % 128 == 0                  # fc row slices are 128-aligned
    assert (h - 1) * stride * WS + 128 <= L0         # fc windows stay in-image
    assert (h - 1) * stride < 128                    # j-taps live inside the window


_check_geometry()


# ---------------------------------------------------------------------------
# In-kernel helpers (trace-time Python, fully static shapes)
# ---------------------------------------------------------------------------
def _shifted(a, delta, roll_is_jnp):
    """Return v with v[:, p] = a[:, p + delta] (circular; tail lanes are junk)."""
    if delta == 0:
        return a
    length = a.shape[1]
    amount = (length - delta) if roll_is_jnp else delta
    return pltpu.roll(a, amount, 1)


def _conv3x3(a, w_ref, b_ref, stride, stack_ref, roll_is_jnp):
    """3x3 VALID conv (+ folded-BN bias) + ReLU as ONE stacked-K matmul.

    a:         (Cin_pad, L)  flat lane-major activation (valid data at this
                             level's stride; Cin_pad is a multiple of 8)
    w_ref:     (Cout_pad, 9*Cin_pad)  columns ordered (kh*3+kw)*Cin_pad + c
    b_ref:     (Cout_pad, 1)
    stack_ref: VMEM scratch, at least (9*Cin_pad, L)
    """
    cin = a.shape[0]
    k = 9 * cin
    assert w_ref.shape[1] == k and stack_ref.shape[0] >= k
    for kh in range(3):
        for kw in range(3):
            t = kh * 3 + kw
            stack_ref[pl.ds(t * cin, cin), :] = _shifted(
                a, stride * (kh * WS + kw), roll_is_jnp)
    acc = jnp.dot(w_ref[...], stack_ref[pl.ds(0, k), :],
                  preferred_element_type=jnp.float32)
    return jnp.maximum(acc + b_ref[...], 0.0)


def _maxpool2x2(a, stride, roll_is_jnp):
    """2x2 stride-2 max pool; result keeps the flat layout at stride 2*stride."""
    t = jnp.maximum(a, _shifted(a, stride, roll_is_jnp))
    return jnp.maximum(t, _shifted(t, stride * WS, roll_is_jnp))


def _simple_cnn_kernel(x_ref,
                       w1, b1, w2, b2, w3, b3, w4, b4, w5, b5, w6, b6,
                       fw1, fb1, fw2, fb2,
                       o_ref, stack_ref, *, roll_is_jnp, images):
    a = x_ref[0]                                   # (8, images*L0), f32

    # Block 1 (spatial stride 1)
    a = _conv3x3(a, w1, b1, 1, stack_ref, roll_is_jnp)
    a = _conv3x3(a, w2, b2, 1, stack_ref, roll_is_jnp)
    a = _maxpool2x2(a, 1, roll_is_jnp)
    # Block 2 (stride 2)
    a = _conv3x3(a, w3, b3, 2, stack_ref, roll_is_jnp)
    a = _conv3x3(a, w4, b4, 2, stack_ref, roll_is_jnp)
    a = _maxpool2x2(a, 2, roll_is_jnp)
    # Block 3 (stride 4)
    a = _conv3x3(a, w5, b5, 4, stack_ref, roll_is_jnp)
    a = _conv3x3(a, w6, b6, 4, stack_ref, roll_is_jnp)
    a = _maxpool2x2(a, 4, roll_is_jnp)             # (16, images*L0), data at stride 8

    # Dropout(0.25): identity at inference.

    # fc head on a 128-lane window per image (only lane 0 of each window is the
    # real answer; the rest is finite garbage we never read back).
    n_ch = a.shape[0]
    assert fw1.shape == (32, FC_H * FC_H * n_ch)
    windows = []
    for img in range(images):
        cols = []
        for i in range(FC_H):
            base = img * L0 + i * 8 * WS           # multiple of 128 -> aligned slice
            s_i = a[:, base:base + 128]            # (16, 128)
            for j in range(FC_H):
                cols.append(_shifted(s_i, 8 * j, roll_is_jnp))
        windows.append(jnp.concatenate(cols, axis=0))       # (256, 128)
    win = jnp.concatenate(windows, axis=1)                   # (256, images*128)

    h = jnp.maximum(jnp.dot(fw1[...], win,
                            preferred_element_type=jnp.float32) + fb1[...], 0.0)
    out = jnp.dot(fw2[...], h, preferred_element_type=jnp.float32) + fb2[...]
    o_ref[0] = out                                            # (out_pad, images*128)


# ---------------------------------------------------------------------------
# Host-side weight prep: fold BN, pad channels to multiples of 8, stack taps.
# ---------------------------------------------------------------------------
def _pad_axis(arr, axis, size):
    pad = size - arr.shape[axis]
    if pad == 0:
        return arr
    widths = [(0, 0)] * arr.ndim
    widths[axis] = (0, pad)
    return jnp.pad(arr, widths)


def _prep_kernel_params(params):
    args = []
    for p in params["convs"]:
        cout, cin = p["w"].shape[:2]
        cin_p, cout_p = _round_up(cin, 8), _round_up(cout, 8)
        scale = p["gamma"] * lax.rsqrt(p["var"] + BN_EPS)          # (cout,)
        w = p["w"] * scale[:, None, None, None]                    # (cout,cin,3,3)
        w = jnp.transpose(w, (2, 3, 0, 1))                         # (kh,kw,cout,cin)
        w = _pad_axis(w, 3, cin_p).reshape(9, cout, cin_p)         # (tap,cout,cin_p)
        w = jnp.transpose(w, (1, 0, 2)).reshape(cout, 9 * cin_p)   # col = tap*cin_p+c
        args.append(_pad_axis(w, 0, cout_p))
        b = (p["b"] - p["mean"]) * scale + p["beta"]
        args.append(_pad_axis(b.reshape(cout, 1), 0, cout_p))
    # fc1: (256, 32) rows ordered c*16 + i*4 + j -> (32, 256) cols (i*4+j)*16 + c
    assert params["fc1"]["w"].shape == (256, 32)
    w1 = params["fc1"]["w"].reshape(16, FC_H, FC_H, 32)            # (c,i,j,o)
    w1 = jnp.transpose(w1, (1, 2, 0, 3)).reshape(256, 32).T        # (32, 256)
    args += [w1, params["fc1"]["b"].reshape(32, 1)]
    # fc2: (32, out) -> (out_pad, 32); pad out channels to 8 for unmasked stores
    out_chs = params["fc2"]["w"].shape[1]
    out_p = _round_up(out_chs, 8)
    args.append(_pad_axis(params["fc2"]["w"].T, 0, out_p))
    args.append(_pad_axis(params["fc2"]["b"].reshape(out_chs, 1), 0, out_p))
    return args


def _full_spec(shape):
    nd = len(shape)
    return pl.BlockSpec(shape, lambda *_: (0,) * nd)


@functools.lru_cache(maxsize=1)
def roll_convention_matches_jnp():
    """Tiny cached probe pinning down pltpu.roll's rotation direction.
    Run once, outside jit."""
    x = jnp.arange(8 * 128, dtype=jnp.int32).reshape(8, 128)

    def probe(x_ref, o_ref):
        o_ref[...] = pltpu.roll(x_ref[...], 1, 1)

    out = pl.pallas_call(
        probe, out_shape=jax.ShapeDtypeStruct((8, 128), jnp.int32))(x)
    return bool(out[0, 0] == x[0, 127])          # True iff same as jnp.roll


def simple_cnn_forward(x, params, *, images_per_step=2, roll_is_jnp=True):
    """Forward pass matching SimpleCNN.eval(); x: (B, 1, 60, 60) -> (B, out_chs)."""
    assert x.shape[2:] == (H_IN, W_IN) and x.shape[1] == 1
    batch = x.shape[0]
    out_chs = params["fc2"]["w"].shape[1]

    g = max(1, min(images_per_step, batch))      # images packed per grid step
    steps = -(-batch // g)
    b_pad = steps * g

    # Only host-side activation prep: pad batch->b_pad, channels 1->8 (zeros),
    # width 60->64 (zeros), then pack g images side-by-side on the lane axis.
    xf = x.astype(jnp.float32)
    xf = jnp.pad(xf, ((0, b_pad - batch), (0, 8 - 1), (0, 0), (0, WS - W_IN)))
    xf = xf.reshape(b_pad, 8, L0).reshape(steps, g, 8, L0)
    xf = jnp.transpose(xf, (0, 2, 1, 3)).reshape(steps, 8, g * L0)

    weights = _prep_kernel_params(params)
    out_p = weights[-1].shape[0]

    in_specs = [pl.BlockSpec((1, 8, g * L0), lambda s: (s, 0, 0))]
    # Whole-array, constant-index weight blocks (~60 KB total) stay resident.
    in_specs += [_full_spec(tuple(w.shape)) for w in weights]

    out = pl.pallas_call(
        functools.partial(_simple_cnn_kernel,
                          roll_is_jnp=roll_is_jnp, images=g),
        out_shape=jax.ShapeDtypeStruct((steps, out_p, g * 128), jnp.float32),
        grid=(steps,),
        in_specs=in_specs,
        out_specs=pl.BlockSpec((1, out_p, g * 128), lambda s: (s, 0, 0)),
        scratch_shapes=[pltpu.VMEM((9 * 16, g * L0), jnp.float32)],
        compiler_params=pltpu.CompilerParams(
            dimension_semantics=("parallel",),
            vmem_limit_bytes=32 * 1024 * 1024),
    )(xf, *weights)

    # Per image, the answer lives at lane g_idx*128 of its step's output block.
    out = out.reshape(steps, out_p, g, 128)[..., 0]            # (steps, out_p, g)
    out = jnp.transpose(out, (0, 2, 1)).reshape(b_pad, out_p)
    return out[:batch, :out_chs]


# ---------------------------------------------------------------------------
# Deterministic synthetic parameters + pure-JAX reference (eval-mode semantics)
# ---------------------------------------------------------------------------
def make_params(key, out_chs=1):
    def conv_bn(k, cin, cout):
        ks = jax.random.split(k, 6)
        return {
            "w": 0.1 * jax.random.normal(ks[0], (cout, cin, 3, 3), jnp.float32),
            "b": 0.05 * jax.random.normal(ks[1], (cout,), jnp.float32),
            "gamma": 1.0 + 0.1 * jax.random.normal(ks[2], (cout,), jnp.float32),
            "beta": 0.05 * jax.random.normal(ks[3], (cout,), jnp.float32),
            "mean": 0.05 * jax.random.normal(ks[4], (cout,), jnp.float32),
            "var": 1.0 + 0.1 * jnp.abs(jax.random.normal(ks[5], (cout,), jnp.float32)),
        }

    keys = jax.random.split(key, 10)
    chans = [(1, 4), (4, 4), (4, 8), (8, 8), (8, 16), (16, 16)]
    return {
        "convs": [conv_bn(keys[i], ci, co) for i, (ci, co) in enumerate(chans)],
        "fc1": {"w": 0.05 * jax.random.normal(keys[6], (256, 32), jnp.float32),
                "b": 0.05 * jax.random.normal(keys[7], (32,), jnp.float32)},
        "fc2": {"w": 0.05 * jax.random.normal(keys[8], (32, out_chs), jnp.float32),
                "b": 0.05 * jax.random.normal(keys[9], (out_chs,), jnp.float32)},
    }


def reference_forward(x, params):
    """Pure-JAX (XLA) reference identical to the PyTorch module in eval mode."""
    hi = lax.Precision.HIGHEST
    a = x.astype(jnp.float32)
    for idx, p in enumerate(params["convs"]):
        a = lax.conv_general_dilated(
            a, p["w"], (1, 1), "VALID",
            dimension_numbers=("NCHW", "OIHW", "NCHW"), precision=hi)
        a = a + p["b"].reshape(1, -1, 1, 1)
        a = ((a - p["mean"].reshape(1, -1, 1, 1))
             * (p["gamma"] * lax.rsqrt(p["var"] + BN_EPS)).reshape(1, -1, 1, 1)
             + p["beta"].reshape(1, -1, 1, 1))
        a = jnp.maximum(a, 0.0)
        if idx % 2 == 1:                                     # after every 2nd conv
            a = lax.reduce_window(a, -jnp.inf, lax.max,
                                  (1, 1, 2, 2), (1, 1, 2, 2), "VALID")
    a = a.reshape(a.shape[0], -1)                            # NCHW flatten
    a = jnp.maximum(jnp.dot(a, params["fc1"]["w"], precision=hi)
                    + params["fc1"]["b"], 0.0)
    return jnp.dot(a, params["fc2"]["w"], precision=hi) + params["fc2"]["b"]


if __name__ == "__main__":
    key = jax.random.PRNGKey(0)
    k_param, k_input = jax.random.split(key)
    params = make_params(k_param, out_chs=1)

    # Input spatial size 60x60 is forced by Linear(256, 32): 16 * 4 * 4 = 256.
    # batch=4 with 2 images packed per grid step -> grid=(2,): exercises the
    # packing path and keeps the grid even for v7x's two TensorCores.
    x = jax.random.normal(k_input, (4, 1, 60, 60), jnp.float32)

    roll_is_jnp = roll_convention_matches_jnp()   # cached, resolved before jit

    fwd = jax.jit(functools.partial(simple_cnn_forward,
                                    images_per_step=2, roll_is_jnp=roll_is_jnp))
    out = jax.block_until_ready(fwd(x, params))
    assert out.shape == (4, 1), out.shape

    ref = jax.block_until_ready(reference_forward(x, params))
    assert bool(jnp.allclose(out, ref, rtol=1e-2, atol=1e-2)), (out, ref)

    print("KERNEL_OK")
</pallas_src>

<mosaic_0001>
module attributes {stable_mosaic.version = 11 : i64} {
  func.func @probe(%arg0: memref<8x128xi32, #tpu.memory_space<vmem>>, %arg1: memref<8x128xi32, #tpu.memory_space<vmem>>) attributes {dimension_semantics = [], scalar_prefetch = 0 : i64, scratch_operands = 0 : i64, tpu.core_type = #tpu.core_type<tc>} {
    %c0 = arith.constant 0 : index
    %c0_0 = arith.constant 0 : index
    %0 = vector.load %arg0[%c0, %c0_0] : memref<8x128xi32, #tpu.memory_space<vmem>>, vector<8x128xi32>
    %c1_i32 = arith.constant 1 : i32
    %1 = tpu.dynamic_rotate %0 by %c1_i32 dim 1 : vector<8x128xi32>, i32 -> vector<8x128xi32>
    %c0_1 = arith.constant 0 : index
    %c0_2 = arith.constant 0 : index
    %2 = vector.load %arg1[%c0_1, %c0_2] : memref<8x128xi32, #tpu.memory_space<vmem>>, vector<8x128xi32>
    tpu.vector_store %arg1[%c0_1, %c0_2], %1 {strides = array<i32>} : memref<8x128xi32, #tpu.memory_space<vmem>>, vector<8x128xi32>,
    return
  }
}

</mosaic_0001>

<bundles_post_ra>
// kernel: tpu_custom_call.1
= control target key start
LH: loop header
LB: loop body
LE: loop exit
PB: predicated region body
PF: predicated region fallthrough
CT: control target
= control target key end

     0   :  { %6 = vsyncpa [#allocation3], 0  ;;  %s128_s0 = inlined_call_operand.hbm [shape: s32[8,128], index: 0, kind: input, shape index: {}]   ;;  %s129_s1 = inlined_call_operand.hbm [shape: s32[8,128], index: 1, kind: output, shape index: {}]  }
   0x1   :  { %7 = vsyncpa [#allocation4], 0  ;;  %s91_s6 = smov [#allocation2]   ;;  %s43_s10 = scalar_lea.hbm %s128_s0, 128 }
   0x2   :  { %s14_s7 = sshll.u32 %s91_s6, 4  ;;  %p44_p0 = scmp.ne.s32.totalorder %s128_s0, %s43_s10  ;;  %s15_s7 = int_to_ptr.vmem [resolvable:$true] %s14_s7 }
   0x3   :  { %p47_p1 = scmp.lt.u32.totalorder %s43_s10, %s128_s0 }
   0x5   :  { %p49_p2 = pnand %p47_p1, %p44_p0 }
   0x7   :  { %52 = shalt.err (!%p49_p2)
}
   0x8   :  { %s53_s15 = scalar_lea.vmem %s15_s7, 128  ;;  %p58_p4 = scmp.lt.s32.totalorder %s15_s7, %s15_s7 }
   0x9   :  { %p54_p3 = scmp.ne.s32.totalorder %s15_s7, %s53_s15  ;;  %p59_p5 = scmp.lt.s32.totalorder %s53_s15, %s53_s15 }
   0xb   :  { %p60_p6 = por %p59_p5, %p58_p4 }
   0xd   :  { %p61_p7 = pnand %p60_p6, %p54_p3 }
   0xf   :  { %64 = shalt.err (!%p61_p7)
}
  0x10   :  { %17 = dma.hbm_to_vmem [thread:$0]  %s128_s0, 128, %s15_s7, [#allocation3]  }
  0x11   :  { %87 = dma.done.wait [#allocation3], 128  }
  0x12   :  { %88 = vsyncadd [#allocation3], 4294967168  ;;  %v21_v0 = vld [vmem:[#allocation2] sm:$0xff]  ;;  %s92_s18 = smov 1   ;;  %s93_s19 = smov [#allocation5]  }
  0x13   :  { %22 = vrot.lane.b32.xlu0 %v21_v0, %s92_s18  ;;  %s31_s20 = sshll.u32 %s93_s19, 4  ;;  %s32_s20 = int_to_ptr.vmem [resolvable:$true] %s31_s20 }
  0x14   :  { %s65_s21 = scalar_lea.vmem %s32_s20, 128  ;;  %p70_p9 = scmp.lt.s32.totalorder %s32_s20, %s32_s20 }
  0x15   :  { %p66_p8 = scmp.ne.s32.totalorder %s32_s20, %s65_s21  ;;  %p71_p10 = scmp.lt.s32.totalorder %s65_s21, %s65_s21 }
  0x17   :  { %p72_p11 = por %p71_p10, %p70_p9 }
  0x19   :  { %p73_p12 = pnand %p72_p11, %p66_p8 }
  0x85   :  { %v23_v1 = vpop.permute.xlu0 %22 }
  0x86   :  { %24 = vst [vmem:[#allocation5] sm:$0xff] %v23_v1 }
  0x87   :  { %76 = shalt.err (!%p73_p12)
}
  0x88   :  { %s77_s0 = scalar_lea.hbm %s129_s1, 128 }
  0x89   :  { %p78_p13 = scmp.ne.s32.totalorder %s129_s1, %s77_s0  ;;  %p81_p0 = scmp.lt.u32.totalorder %s77_s0, %s129_s1 }
  0x8b   :  { %p83_p1 = pnand %p81_p0, %p78_p13 }
  0x8d   :  { %86 = shalt.err (!%p83_p1)
}
  0x8e   :  { %34 = dma.vmem_to_hbm [thread:$0]  %s32_s20, 128, %s129_s1, [#allocation4]  }
  0x8f   :  { %89 = dma.done.wait [#allocation4], 128  }
  0x90   :  { %90 = vsyncadd [#allocation4], 4294967168 }
  0x91   :  { %38 = vsyncpa [#allocation3], 1 }
  0x92   :  { %39 = vsyncpa [#allocation4], 1 }

</bundles_post_ra>
